<compile_context>
chip_gen: v5e
topology: v5e:2x2
jax: 0.10.0
libtpu: 0.0.40
codegen_flags: <defaults>
</compile_context>

<pallas_src>
import functools

import jax
import jax.numpy as jnp
from jax.experimental import pallas as pl
from jax.experimental.pallas import tpu as pltpu

LANE = 128      # TPU lane width (last-dim tiling unit)
SUBLANE_F32 = 8  # f32 sublane height (second-to-last dim tiling unit)


def _round_up(n: int, m: int) -> int:
    return ((n + m - 1) // m) * m


def _mxu_lane_multiple() -> int:
    """Preferred N-tile width for the local MXU generation (128 or 256)."""
    try:
        kind = jax.devices()[0].device_kind.lower()
    except Exception:  # pragma: no cover
        return LANE
    if "v6" in kind or "v7" in kind or "7x" in kind:
        return 2 * LANE   # v6e / v7x: 2x256^2 MXU
    return LANE           # v5e (4x128^2) and unknown chips: 128 is safe


def _pad_feature_dim(dim: int) -> int:
    """Lane-pad a feature dim: never inflate dims <=128 past 128; round larger
    dims to the MXU-native tile width (256 on v6e/v7x, 128 on v5e)."""
    if dim <= LANE:
        return LANE
    return _round_up(dim, _mxu_lane_multiple())


# -----------------------------------------------------------------------------
# Pallas kernel: fused Linear -> ReLU -> Linear (per batch tile)
# -----------------------------------------------------------------------------
def _mlp_kernel(x_ref, w1_ref, b1_ref, w2_ref, b2_ref, o_ref):
    # x arrives as f32 straight from HBM; downcast to bf16 on the VPU right
    # before the MXU (saves a separate wrapper-side cast pass over x).
    x_bf = x_ref[...].astype(w1_ref.dtype)
    # First linear (MXU, bf16 in / f32 accumulate) + bias + ReLU on the f32 VPU.
    h = jnp.dot(x_bf, w1_ref[...], preferred_element_type=jnp.float32)
    h = jnp.maximum(h + b1_ref[...], 0.0)          # b1 is (1, HID_P) -> broadcast
    # Second linear: downcast activations to bf16 for the MXU, accumulate f32.
    y = jnp.dot(h.astype(w2_ref.dtype), w2_ref[...],
                preferred_element_type=jnp.float32)
    o_ref[...] = (y + b2_ref[...]).astype(o_ref.dtype)


@functools.partial(jax.jit, static_argnames=("out_features", "single_buffer"))
def mlp_forward(x, w1, b1, w2, b2, *, out_features, single_buffer=True):
    """Fused MLP forward.

    x : (batch, IN) f32 (cast to bf16 inside the kernel)
    w1: (IN, HID_P) bf16, b1: (1, HID_P) f32
    w2: (HID_P, OUT_P) bf16, b2: (1, OUT_P) f32
    HID_P / OUT_P are already lane-padded.  Batch is tiled along a 1-D
    "parallel" grid; weights/biases stay resident in VMEM (single-buffered).
    """
    batch, in_features = x.shape
    hid_p = w1.shape[1]
    out_p = w2.shape[1]

    # Batch tile: sublane-aligned, capped at 512 rows, and sized so the grid
    # has at least 2 steps whenever batch allows (v7x dual-core sharding).
    half = -(-batch // 2)
    tb = max(SUBLANE_F32, min(512, _round_up(half, SUBLANE_F32)))
    grid = (pl.cdiv(batch, tb),)   # ragged last block is fine: row-local math

    # Single-buffer the constant-index weight/bias operands (no re-fetch).
    w_mode = {"pipeline_mode": pl.Buffered(1)} if single_buffer else {}
    wbuf = 1 if single_buffer else 2

    # VMEM budget estimate (bytes): streamed x/out tiles (double-buffered),
    # resident weights/biases, and the f32 + bf16 hidden temporaries.
    est = (2 * tb * in_features * 4
           + 2 * tb * out_p * 4
           + wbuf * (in_features * hid_p * 2 + hid_p * 4
                     + hid_p * out_p * 2 + out_p * 4)
           + tb * hid_p * (4 + 2))
    vmem_limit = None
    if est > 24 * (1 << 20):
        vmem_limit = min(int(est * 1.5) + (1 << 20), 120 * (1 << 20))
    # TODO(synk): if the resident weight set exceeds ~48 MiB (v7x's 64 MiB VMEM),
    # add a hidden-dim ("arbitrary") grid axis with a pl.when-gated f32 VMEM
    # accumulator instead of keeping both weights fully resident.

    out_padded = pl.pallas_call(
        _mlp_kernel,
        out_shape=jax.ShapeDtypeStruct((batch, out_p), x.dtype),
        grid=grid,
        in_specs=[
            # x: streams one batch tile per grid step (pipelined).
            pl.BlockSpec((tb, in_features), lambda i: (i, 0)),
            # Weights / biases: constant index_map -> VMEM-resident across steps.
            pl.BlockSpec((in_features, hid_p), lambda i: (0, 0), **w_mode),
            pl.BlockSpec((1, hid_p), lambda i: (0, 0), **w_mode),
            pl.BlockSpec((hid_p, out_p), lambda i: (0, 0), **w_mode),
            pl.BlockSpec((1, out_p), lambda i: (0, 0), **w_mode),
        ],
        out_specs=pl.BlockSpec((tb, out_p), lambda i: (i, 0)),
        compiler_params=pltpu.CompilerParams(
            dimension_semantics=("parallel",),
            vmem_limit_bytes=vmem_limit),
    )(x, w1, b1, w2, b2)

    # Only the zero-padded output lanes need slicing (batch was never padded).
    # TODO(synk): downstream consumers that tolerate lane padding could take
    # `out_padded` directly and skip this slice pass entirely.
    return out_padded[:, :out_features]


# -----------------------------------------------------------------------------
# BaseNetwork analogue (glue only; all compute lives in the Pallas kernel)
# -----------------------------------------------------------------------------
class BaseNetworkPallas:
    """Mirrors BaseNetwork: destructures `tabular` by `model_keys`, builds the
    model parameters, and forward(x) applies the model (fused Pallas MLP)."""

    def __init__(self, tabular, model_keys, visualise=False, seed=0):
        self.tabular = tabular
        self.model_keys = model_keys
        self.visualise = visualise
        self._single_buffer_weights = True
        sizes = self._get_params(tabular, model_keys)
        self.output_size = sizes[2]
        self.params = self._build_model(*sizes, seed=seed)
        if visualise:
            print(self)

    # _get_params: destructure a dict (the `is_dict` path of the original).
    # TODO(synk): the pd.DataFrame (`is_df`) branch of the original is not
    # reproduced here (no pandas dependency in-kernel).
    def _get_params(self, tabular, model_keys):
        missing = [k for k in model_keys if k not in tabular]
        if missing:
            raise KeyError(f"missing model keys: {missing}")
        return [tabular[k] for k in model_keys]

    # _build_model / _create_layers: concrete 2-layer MLP parameters with
    # PyTorch-Linear-style uniform init.  Weights are stored pre-transposed,
    # lane-padded (MXU-generation aware), and cast to bf16 for the MXU; biases
    # stay f32 (epilogue runs on the f32 accumulator).
    def _build_model(self, input_size, hidden_size, output_size, *, seed=0):
        key = jax.random.PRNGKey(seed)
        k1, k2, k3, k4 = jax.random.split(key, 4)
        bound1 = 1.0 / (input_size ** 0.5)
        bound2 = 1.0 / (hidden_size ** 0.5)
        w1 = jax.random.uniform(k1, (input_size, hidden_size), jnp.float32,
                                -bound1, bound1)
        b1 = jax.random.uniform(k2, (hidden_size,), jnp.float32,
                                -bound1, bound1)
        w2 = jax.random.uniform(k3, (hidden_size, output_size), jnp.float32,
                                -bound2, bound2)
        b2 = jax.random.uniform(k4, (output_size,), jnp.float32,
                                -bound2, bound2)

        hid_p = _pad_feature_dim(hidden_size)
        out_p = _pad_feature_dim(output_size)
        # Zero-padding preserves the math exactly: padded hidden units see zero
        # weight and zero bias -> ReLU(0)=0 -> contribute nothing downstream.
        w1p = jnp.pad(w1, ((0, 0), (0, hid_p - hidden_size))).astype(jnp.bfloat16)
        b1p = jnp.pad(b1, (0, hid_p - hidden_size)).reshape(1, hid_p)
        w2p = jnp.pad(w2, ((0, hid_p - hidden_size),
                           (0, out_p - output_size))).astype(jnp.bfloat16)
        b2p = jnp.pad(b2, (0, out_p - output_size)).reshape(1, out_p)
        return (w1p, b1p, w2p, b2p)

    def forward(self, x):
        if self._single_buffer_weights:
            try:
                return mlp_forward(x, *self.params,
                                   out_features=self.output_size,
                                   single_buffer=True)
            except Exception:
                # Feature probe: fall back to default (double) buffering if this
                # jax build rejects pipeline_mode=pl.Buffered(1).
                self._single_buffer_weights = False
        return mlp_forward(x, *self.params, out_features=self.output_size,
                           single_buffer=False)

    __call__ = forward


# -----------------------------------------------------------------------------
if __name__ == "__main__":
    # Tabular spec + keys, as BaseNetwork.__init__ expects.
    tabular = {"input_size": 32, "hidden_size": 64, "output_size": 16}
    model_keys = ("input_size", "hidden_size", "output_size")

    net = BaseNetworkPallas(tabular, model_keys, visualise=False, seed=0)

    batch = 8
    x = jax.random.normal(jax.random.PRNGKey(0), (batch, tabular["input_size"]),
                          dtype=jnp.float32)

    out = net(x)
    out = jax.block_until_ready(out)
    assert out.shape == (batch, tabular["output_size"])
    assert out.dtype == jnp.float32

    # Pure-JAX reference (same mixed-precision path: bf16 matmul operands,
    # f32 accumulation/epilogue) on the unpadded parameter slices.
    hid, nout = tabular["hidden_size"], tabular["output_size"]
    w1p, b1p, w2p, b2p = net.params
    w1f = w1p.astype(jnp.float32)[:, :hid]
    b1f = b1p[0, :hid]
    w2f = w2p.astype(jnp.float32)[:hid, :nout]
    b2f = b2p[0, :nout]
    xq = x.astype(jnp.bfloat16).astype(jnp.float32)
    h_ref = jnp.maximum(xq @ w1f + b1f, 0.0)
    ref = h_ref.astype(jnp.bfloat16).astype(jnp.float32) @ w2f + b2f

    assert jnp.allclose(out, ref, atol=2e-3, rtol=2e-3), (
        float(jnp.max(jnp.abs(out - ref))))

    print("KERNEL_OK")
</pallas_src>

<mosaic_0001>
module attributes {stable_mosaic.version = 11 : i64} {
  func.func @_mlp_kernel(%arg0: i32, %arg1: memref<8x32xf32, #tpu.memory_space<vmem>>, %arg2: memref<32x128xbf16, #tpu.memory_space<vmem>>, %arg3: memref<1x128xf32, #tpu.memory_space<vmem>>, %arg4: memref<128x128xbf16, #tpu.memory_space<vmem>>, %arg5: memref<1x128xf32, #tpu.memory_space<vmem>>, %arg6: memref<8x128xf32, #tpu.memory_space<vmem>>) attributes {dimension_semantics = [#tpu.dimension_semantics<parallel>], iteration_bounds = array<i64: 1>, scalar_prefetch = 0 : i64, scratch_operands = 0 : i64, tpu.core_type = #tpu.core_type<tc>, window_params = [{transform_indices = @transform_0, window_bounds = array<i64: 8, 32>}, {pipeline_mode = #tpu.pipeline_mode<synchronous>, transform_indices = @transform_1, window_bounds = array<i64: 32, 128>}, {pipeline_mode = #tpu.pipeline_mode<synchronous>, transform_indices = @transform_2, window_bounds = array<i64: 1, 128>}, {pipeline_mode = #tpu.pipeline_mode<synchronous>, transform_indices = @transform_3, window_bounds = array<i64: 128, 128>}, {pipeline_mode = #tpu.pipeline_mode<synchronous>, transform_indices = @transform_4, window_bounds = array<i64: 1, 128>}, {transform_indices = @transform_5, window_bounds = array<i64: 8, 128>}]} {
    %c0 = arith.constant 0 : index
    %c0_0 = arith.constant 0 : index
    %0 = vector.load %arg1[%c0, %c0_0] : memref<8x32xf32, #tpu.memory_space<vmem>>, vector<8x32xf32>
    %1 = arith.truncf %0 : vector<8x32xf32> to vector<8x32xbf16>
    %c0_1 = arith.constant 0 : index
    %c0_2 = arith.constant 0 : index
    %2 = vector.load %arg2[%c0_1, %c0_2] : memref<32x128xbf16, #tpu.memory_space<vmem>>, vector<32x128xbf16>
    %cst = arith.constant dense<0.000000e+00> : vector<8x128xf32>
    %3 = tpu.matmul %1, %2, %cst {dimension_numbers = #tpu.dot_dimension_numbers<[1], [0], [0], [1], [0, 0, 1, 1], [], []>} : vector<8x32xbf16>, vector<32x128xbf16>, vector<8x128xf32> -> vector<8x128xf32>
    %c0_3 = arith.constant 0 : index
    %c0_4 = arith.constant 0 : index
    %4 = vector.load %arg3[%c0_3, %c0_4] : memref<1x128xf32, #tpu.memory_space<vmem>>, vector<1x128xf32>
    %5 = vector.broadcast %4 : vector<1x128xf32> to vector<8x128xf32>
    %6 = arith.addf %3, %5 : vector<8x128xf32>
    %cst_5 = arith.constant 0.000000e+00 : f32
    %7 = vector.broadcast %cst_5 : f32 to vector<8x128xf32>
    %8 = arith.maximumf %6, %7 : vector<8x128xf32>
    %9 = arith.truncf %8 : vector<8x128xf32> to vector<8x128xbf16>
    %c0_6 = arith.constant 0 : index
    %c0_7 = arith.constant 0 : index
    %10 = vector.load %arg4[%c0_6, %c0_7] : memref<128x128xbf16, #tpu.memory_space<vmem>>, vector<128x128xbf16>
    %cst_8 = arith.constant dense<0.000000e+00> : vector<8x128xf32>
    %11 = tpu.matmul %9, %10, %cst_8 {dimension_numbers = #tpu.dot_dimension_numbers<[1], [0], [0], [1], [0, 0, 1, 1], [], []>} : vector<8x128xbf16>, vector<128x128xbf16>, vector<8x128xf32> -> vector<8x128xf32>
    %c0_9 = arith.constant 0 : index
    %c0_10 = arith.constant 0 : index
    %12 = vector.load %arg5[%c0_9, %c0_10] : memref<1x128xf32, #tpu.memory_space<vmem>>, vector<1x128xf32>
    %13 = vector.broadcast %12 : vector<1x128xf32> to vector<8x128xf32>
    %14 = arith.addf %11, %13 : vector<8x128xf32>
    %c0_11 = arith.constant 0 : index
    %c0_12 = arith.constant 0 : index
    %15 = vector.load %arg6[%c0_11, %c0_12] : memref<8x128xf32, #tpu.memory_space<vmem>>, vector<8x128xf32>
    tpu.vector_store %arg6[%c0_11, %c0_12], %14 {strides = array<i32>} : memref<8x128xf32, #tpu.memory_space<vmem>>, vector<8x128xf32>,
    return
  }
  func.func @transform_0(%arg0: i32) -> (i32, i32) {
    %c0_i32 = arith.constant 0 : i32
    %c0_i32_0 = arith.constant 0 : i32
    return %arg0, %c0_i32 : i32, i32
  }
  func.func @transform_1(%arg0: i32) -> (i32, i32) {
    %c0_i32 = arith.constant 0 : i32
    %c0_i32_0 = arith.constant 0 : i32
    %c0_i32_1 = arith.constant 0 : i32
    return %c0_i32, %c0_i32_0 : i32, i32
  }
  func.func @transform_2(%arg0: i32) -> (i32, i32) {
    %c0_i32 = arith.constant 0 : i32
    %c0_i32_0 = arith.constant 0 : i32
    %c0_i32_1 = arith.constant 0 : i32
    return %c0_i32, %c0_i32_0 : i32, i32
  }
  func.func @transform_3(%arg0: i32) -> (i32, i32) {
    %c0_i32 = arith.constant 0 : i32
    %c0_i32_0 = arith.constant 0 : i32
    %c0_i32_1 = arith.constant 0 : i32
    return %c0_i32, %c0_i32_0 : i32, i32
  }
  func.func @transform_4(%arg0: i32) -> (i32, i32) {
    %c0_i32 = arith.constant 0 : i32
    %c0_i32_0 = arith.constant 0 : i32
    %c0_i32_1 = arith.constant 0 : i32
    return %c0_i32, %c0_i32_0 : i32, i32
  }
  func.func @transform_5(%arg0: i32) -> (i32, i32) {
    %c0_i32 = arith.constant 0 : i32
    %c0_i32_0 = arith.constant 0 : i32
    return %arg0, %c0_i32 : i32, i32
  }
}

module attributes {stable_mosaic.version = 11 : i64} {
  func.func @_mlp_kernel(%arg0: i32, %arg1: memref<8x32xf32, #tpu.memory_space<vmem>>, %arg2: memref<32x128xbf16, #tpu.memory_space<vmem>>, %arg3: memref<1x128xf32, #tpu.memory_space<vmem>>, %arg4: memref<128x128xbf16, #tpu.memory_space<vmem>>, %arg5: memref<1x128xf32, #tpu.memory_space<vmem>>, %arg6: memref<8x128xf32, #tpu.memory_space<vmem>>) attributes {dimension_semantics = [#tpu.dimension_semantics<parallel>], iteration_bounds = array<i64: 1>, scalar_prefetch = 0 : i64, scratch_operands = 0 : i64, tpu.core_type = #tpu.core_type<tc>, window_params = [{transform_indices = @transform_0, window_bounds = array<i64: 8, 32>}, {pipeline_mode = #tpu.pipeline_mode<synchronous>, transform_indices = @transform_1, window_bounds = array<i64: 32, 128>}, {pipeline_mode = #tpu.pipeline_mode<synchronous>, transform_indices = @transform_2, window_bounds = array<i64: 1, 128>}, {pipeline_mode = #tpu.pipeline_mode<synchronous>, transform_indices = @transform_3, window_bounds = array<i64: 128, 128>}, {pipeline_mode = #tpu.pipeline_mode<synchronous>, transform_indices = @transform_4, window_bounds = array<i64: 1, 128>}, {transform_indices = @transform_5, window_bounds = array<i64: 8, 128>}]} {
    %c0 = arith.constant 0 : index
    %c0_0 = arith.constant 0 : index
    %0 = vector.load %arg1[%c0, %c0_0] : memref<8x32xf32, #tpu.memory_space<vmem>>, vector<8x32xf32>
    %1 = arith.truncf %0 : vector<8x32xf32> to vector<8x32xbf16>
    %c0_1 = arith.constant 0 : index
    %c0_2 = arith.constant 0 : index
    %2 = vector.load %arg2[%c0_1, %c0_2] : memref<32x128xbf16, #tpu.memory_space<vmem>>, vector<32x128xbf16>
    %cst = arith.constant dense<0.000000e+00> : vector<8x128xf32>
    %3 = tpu.matmul %1, %2, %cst {dimension_numbers = #tpu.dot_dimension_numbers<[1], [0], [0], [1], [0, 0, 1, 1], [], []>} : vector<8x32xbf16>, vector<32x128xbf16>, vector<8x128xf32> -> vector<8x128xf32>
    %c0_3 = arith.constant 0 : index
    %c0_4 = arith.constant 0 : index
    %4 = vector.load %arg3[%c0_3, %c0_4] : memref<1x128xf32, #tpu.memory_space<vmem>>, vector<1x128xf32>
    %5 = vector.broadcast %4 : vector<1x128xf32> to vector<8x128xf32>
    %6 = arith.addf %3, %5 : vector<8x128xf32>
    %cst_5 = arith.constant 0.000000e+00 : f32
    %7 = vector.broadcast %cst_5 : f32 to vector<8x128xf32>
    %8 = arith.maximumf %6, %7 : vector<8x128xf32>
    %9 = arith.truncf %8 : vector<8x128xf32> to vector<8x128xbf16>
    %c0_6 = arith.constant 0 : index
    %c0_7 = arith.constant 0 : index
    %10 = vector.load %arg4[%c0_6, %c0_7] : memref<128x128xbf16, #tpu.memory_space<vmem>>, vector<128x128xbf16>
    %cst_8 = arith.constant dense<0.000000e+00> : vector<8x128xf32>
    %11 = tpu.matmul %9, %10, %cst_8 {dimension_numbers = #tpu.dot_dimension_numbers<[1], [0], [0], [1], [0, 0, 1, 1], [], []>} : vector<8x128xbf16>, vector<128x128xbf16>, vector<8x128xf32> -> vector<8x128xf32>
    %c0_9 = arith.constant 0 : index
    %c0_10 = arith.constant 0 : index
    %12 = vector.load %arg5[%c0_9, %c0_10] : memref<1x128xf32, #tpu.memory_space<vmem>>, vector<1x128xf32>
    %13 = vector.broadcast %12 : vector<1x128xf32> to vector<8x128xf32>
    %14 = arith.addf %11, %13 : vector<8x128xf32>
    %c0_11 = arith.constant 0 : index
    %c0_12 = arith.constant 0 : index
    %15 = vector.load %arg6[%c0_11, %c0_12] : memref<8x128xf32, #tpu.memory_space<vmem>>, vector<8x128xf32>
    tpu.vector_store %arg6[%c0_11, %c0_12], %14 {strides = array<i32>} : memref<8x128xf32, #tpu.memory_space<vmem>>, vector<8x128xf32>,
    return
  }
  func.func @transform_0(%arg0: i32) -> (i32, i32) {
    %c0_i32 = arith.constant 0 : i32
    %c0_i32_0 = arith.constant 0 : i32
    return %arg0, %c0_i32 : i32, i32
  }
  func.func @transform_1(%arg0: i32) -> (i32, i32) {
    %c0_i32 = arith.constant 0 : i32
    %c0_i32_0 = arith.constant 0 : i32
    %c0_i32_1 = arith.constant 0 : i32
    return %c0_i32, %c0_i32_0 : i32, i32
  }
  func.func @transform_2(%arg0: i32) -> (i32, i32) {
    %c0_i32 = arith.constant 0 : i32
    %c0_i32_0 = arith.constant 0 : i32
    %c0_i32_1 = arith.constant 0 : i32
    return %c0_i32, %c0_i32_0 : i32, i32
  }
  func.func @transform_3(%arg0: i32) -> (i32, i32) {
    %c0_i32 = arith.constant 0 : i32
    %c0_i32_0 = arith.constant 0 : i32
    %c0_i32_1 = arith.constant 0 : i32
    return %c0_i32, %c0_i32_0 : i32, i32
  }
  func.func @transform_4(%arg0: i32) -> (i32, i32) {
    %c0_i32 = arith.constant 0 : i32
    %c0_i32_0 = arith.constant 0 : i32
    %c0_i32_1 = arith.constant 0 : i32
    return %c0_i32, %c0_i32_0 : i32, i32
  }
  func.func @transform_5(%arg0: i32) -> (i32, i32) {
    %c0_i32 = arith.constant 0 : i32
    %c0_i32_0 = arith.constant 0 : i32
    return %arg0, %c0_i32 : i32, i32
  }
}

</mosaic_0001>

<bundles_post_ra>
// kernel: mlp_forward.1
= control target key start
LH: loop header
LB: loop body
LE: loop exit
PB: predicated region body
PF: predicated region fallthrough
CT: control target
= control target key end

     0   :  { %10 = vsyncpa [#allocation3], 0  ;;  %s423_s0 = inlined_call_operand.hbm [shape: f32[8,32], index: 0, kind: input, shape index: {}]   ;;  %s424_s1 = inlined_call_operand.hbm [shape: bf16[32,128], index: 1, kind: input, shape index: {}]   ;;  %s425_s2 = inlined_call_operand.vmem [shape: f32[1,128], index: 2, kind: input, shape index: {}]   ;;  %s426_s3 = inlined_call_operand.hbm [shape: bf16[128,128], index: 3, kind: input, shape index: {}]   ;;  %s427_s4 = inlined_call_operand.vmem [shape: f32[1,128], index: 4, kind: input, shape index: {}]   ;;  %s428_s5 = inlined_call_operand.hbm [shape: f32[8,128], index: 5, kind: output, shape index: {}]  }
   0x1   :  { %11 = vsyncpa [#allocation6], 0  ;;  %s28_s20 = sshll.u32 %s424_s1, 4  ;;  %s29_s20 = int_to_ptr.hbm [resolvable:$true] %s28_s20 }
   0x2   :  { %12 = vsyncpa [#allocation4], 0  ;;  %s369_s21 = smov [#allocation5]   ;;  %s18_s25 = sshll.u32 %s423_s0, 4  ;;  %s19_s25 = int_to_ptr.hbm [resolvable:$true] %s18_s25 }
   0x3   :  { %s30_s22 = sshll.u32 %s369_s21, 4  ;;  %s370_s26 = smov 64   ;;  %s31_s22 = int_to_ptr.vmem [resolvable:$true] %s30_s22 }
   0x4   :  { %s371_s27 = smov 4   ;;  %s372_s28 = smov [#allocation2]  }
   0x5   :  { %36 = dma.hbm_to_vmem [thread:$0]  %s29_s20, 256, %s31_s22, [#allocation6], %s370_s26, %s370_s26, %s371_s27  }
   0x6   :  { %s20_s29 = sshll.u32 %s372_s28, 4  ;;  %s43_s7 = sshll.u32 %s426_s3, 4  ;;  %s21_s29 = int_to_ptr.vmem [resolvable:$true] %s20_s29  ;;  %s44_s7 = int_to_ptr.hbm [resolvable:$true] %s43_s7 }
   0x7   :  { %23 = dma.hbm_to_vmem [thread:$0]  %s19_s25, 128, %s21_s29, [#allocation3]  }
   0x8   :  { %s373_s1 = smov [#allocation7]  }
   0x9   :  { %s45_s8 = sshll.u32 %s373_s1, 4  ;;  %s46_s8 = int_to_ptr.vmem [resolvable:$true] %s45_s8 }
   0xa   :  { %51 = dma.hbm_to_vmem [thread:$0]  %s44_s7, 1024, %s46_s8, [#allocation6], %s370_s26, %s370_s26, %s371_s27  }
   0xb   :  { %363 = dma.done.wait [#allocation3], 128  }
   0xc   :  { %364 = vsyncadd [#allocation3], 4294967168 }
   0xd   :  { %365 = dma.done.wait [#allocation6], 1280  }
   0xe   :  { %366 = vsyncadd [#allocation6], 4294966016  ;;  %v250_v0 = vld [vmem:[#allocation5 + $0x8] sm:$0xff]  ;;  %v249_v2 = vld [vmem:[#allocation5] sm:$0xff]  ;;  %vm89_vm0 = vcmask 261120   ;;  %s374_s11 = smov [#allocation8]  }
   0xf   :  { %v258_v1 = vld [vmem:[#allocation7 + $0x38] sm:$0xff]  ;;  %99 = vmatpush.bf16.msra.mxu0 %v250_v0  ;;  %v67_v3 = vld [vmem:[#allocation2] sm:$0xff]  ;;  %v257_v4 = vld [vmem:[#allocation7 + $0x30] sm:$0xff]  ;;  %s195_s12 = sshll.u32 %s374_s11, 4  ;;  %s197_s15 = sshll.u32 %s428_s5, 4  ;;  %s196_s12 = int_to_ptr.vmem [resolvable:$true] %s195_s12  ;;  %s198_s15 = int_to_ptr.hbm [resolvable:$true] %s197_s15 }
  0x10   :  { %176 = vmatpush.bf16.msra.mxu1 %v258_v1  ;;  %v68_v5 = vpack.c.bf16 %v67_v3, %v67_v3  ;;  %v256_v6 = vld [vmem:[#allocation7 + $0x28] sm:$0xff]  ;;  %v255_v7 = vld [vmem:[#allocation7 + $0x20] sm:$0xff]  ;;  %v254_v8 = vld [vmem:[#allocation7 + $0x18] sm:$0xff] }
  0x11   :  { %v253_v9 = vld [vmem:[#allocation7 + $0x10] sm:$0xff]  ;;  %v252_v10 = vld [vmem:[#allocation7 + $0x8] sm:$0xff]  ;;  %v251_v11 = vld [vmem:[#allocation7] sm:$0xff] }
  0x12   :  { %v265_v12 = vld [vmem:[%s425_s2] ss:$0 sm:$0xff] }
  0x13   :  { %100 = vmatpush.bf16.msra.mxu0 %v249_v2  ;;  %v266_v18 = vld [vmem:[%s427_s4] ss:$0 sm:$0xff] }
  0x14   :  { %177 = vmatpush.bf16.msra.mxu1 %v257_v4 }
  0x16   :  { %216 = vmatmul.msk.bf16.vlgmr.msra.gmra.mxu0 %vm89_vm0, %v68_v5 }
  0x18   :  { %178 = vmatpush.bf16.msra.mxu1 %v256_v6 }
  0x1c   :  { %179 = vmatpush.bf16.msra.mxu1 %v255_v7 }
  0x20   :  { %180 = vmatpush.bf16.msra.mxu1 %v254_v8 }
  0x24   :  { %181 = vmatpush.bf16.msra.mxu1 %v253_v9 }
  0x28   :  { %182 = vmatpush.bf16.msra.mxu1 %v252_v10 }
  0x2c   :  { %183 = vmatpush.bf16.msra.mxu1 %v251_v11 }
  0x93   :  { %v102_v13 = vpop.f32.mrf.mxu0 }
  0x94   :  { %v103_v14 = vadd.f32 %v265_v12, %v102_v13 }
  0x96   :  { %v106_v15 = vmax.f32 %v103_v14, 0.0 }
  0x98   :  { %v107_v16 = vpack.c.bf16 %v106_v15, %v106_v15 }
  0x9a   :  { %184 = vmatmul.bf16.vlgmr.msra.gmra.mxu1 %v107_v16 }
  0x9b   :  { %v104_v17 = vpop.f32.mrf.mxu0 }
 0x117   :  { %v185_v19 = vpop.f32.mrf.mxu1 }
 0x118   :  { %v186_v20 = vadd.f32 %v266_v18, %v185_v19 }
 0x11a   :  { %189 = vst [vmem:[#allocation8] sm:$0xff] %v186_v20 }
 0x11b   :  { %200 = dma.vmem_to_hbm [thread:$0]  %s196_s12, 128, %s198_s15, [#allocation4]  }
 0x11f   :  { %v187_v21 = vpop.f32.mrf.mxu1 }
 0x120   :  { %367 = dma.done.wait [#allocation4], 128  }
 0x121   :  { %368 = vsyncadd [#allocation4], 4294967168 }
 0x122   :  { %205 = vsyncpa [#allocation3], 1 }
 0x123   :  { %206 = vsyncpa [#allocation6], 1 }
 0x124   :  { %207 = vsyncpa [#allocation4], 1 }

// kernel: mlp_forward.1
= control target key start
LH: loop header
LB: loop body
LE: loop exit
PB: predicated region body
PF: predicated region fallthrough
CT: control target
= control target key end

     0   :  { %10 = vsyncpa [#allocation3], 0  ;;  %s423_s0 = inlined_call_operand.hbm [shape: f32[8,32], index: 0, kind: input, shape index: {}]   ;;  %s424_s1 = inlined_call_operand.hbm [shape: bf16[32,128], index: 1, kind: input, shape index: {}]   ;;  %s425_s2 = inlined_call_operand.vmem [shape: f32[1,128], index: 2, kind: input, shape index: {}]   ;;  %s426_s3 = inlined_call_operand.hbm [shape: bf16[128,128], index: 3, kind: input, shape index: {}]   ;;  %s427_s4 = inlined_call_operand.vmem [shape: f32[1,128], index: 4, kind: input, shape index: {}]   ;;  %s428_s5 = inlined_call_operand.hbm [shape: f32[8,128], index: 5, kind: output, shape index: {}]  }
   0x1   :  { %11 = vsyncpa [#allocation6], 0  ;;  %s28_s20 = sshll.u32 %s424_s1, 4  ;;  %s29_s20 = int_to_ptr.hbm [resolvable:$true] %s28_s20 }
   0x2   :  { %12 = vsyncpa [#allocation4], 0  ;;  %s369_s21 = smov [#allocation5]   ;;  %s18_s25 = sshll.u32 %s423_s0, 4  ;;  %s19_s25 = int_to_ptr.hbm [resolvable:$true] %s18_s25 }
   0x3   :  { %s30_s22 = sshll.u32 %s369_s21, 4  ;;  %s370_s26 = smov 64   ;;  %s31_s22 = int_to_ptr.vmem [resolvable:$true] %s30_s22 }
   0x4   :  { %s371_s27 = smov 4   ;;  %s372_s28 = smov [#allocation2]  }
   0x5   :  { %36 = dma.hbm_to_vmem [thread:$0]  %s29_s20, 256, %s31_s22, [#allocation6], %s370_s26, %s370_s26, %s371_s27  }
   0x6   :  { %s20_s29 = sshll.u32 %s372_s28, 4  ;;  %s43_s7 = sshll.u32 %s426_s3, 4  ;;  %s21_s29 = int_to_ptr.vmem [resolvable:$true] %s20_s29  ;;  %s44_s7 = int_to_ptr.hbm [resolvable:$true] %s43_s7 }
   0x7   :  { %23 = dma.hbm_to_vmem [thread:$0]  %s19_s25, 128, %s21_s29, [#allocation3]  }
   0x8   :  { %s373_s1 = smov [#allocation7]  }
   0x9   :  { %s45_s8 = sshll.u32 %s373_s1, 4  ;;  %s46_s8 = int_to_ptr.vmem [resolvable:$true] %s45_s8 }
   0xa   :  { %51 = dma.hbm_to_vmem [thread:$0]  %s44_s7, 1024, %s46_s8, [#allocation6], %s370_s26, %s370_s26, %s371_s27  }
   0xb   :  { %363 = dma.done.wait [#allocation3], 128  }
   0xc   :  { %364 = vsyncadd [#allocation3], 4294967168 }
   0xd   :  { %365 = dma.done.wait [#allocation6], 1280  }
   0xe   :  { %366 = vsyncadd [#allocation6], 4294966016  ;;  %v250_v0 = vld [vmem:[#allocation5 + $0x8] sm:$0xff]  ;;  %v249_v2 = vld [vmem:[#allocation5] sm:$0xff]  ;;  %vm89_vm0 = vcmask 261120   ;;  %s374_s11 = smov [#allocation8]  }
   0xf   :  { %v258_v1 = vld [vmem:[#allocation7 + $0x38] sm:$0xff]  ;;  %99 = vmatpush.bf16.msra.mxu0 %v250_v0  ;;  %v67_v3 = vld [vmem:[#allocation2] sm:$0xff]  ;;  %v257_v4 = vld [vmem:[#allocation7 + $0x30] sm:$0xff]  ;;  %s195_s12 = sshll.u32 %s374_s11, 4  ;;  %s197_s15 = sshll.u32 %s428_s5, 4  ;;  %s196_s12 = int_to_ptr.vmem [resolvable:$true] %s195_s12  ;;  %s198_s15 = int_to_ptr.hbm [resolvable:$true] %s197_s15 }
  0x10   :  { %176 = vmatpush.bf16.msra.mxu1 %v258_v1  ;;  %v68_v5 = vpack.c.bf16 %v67_v3, %v67_v3  ;;  %v256_v6 = vld [vmem:[#allocation7 + $0x28] sm:$0xff]  ;;  %v255_v7 = vld [vmem:[#allocation7 + $0x20] sm:$0xff]  ;;  %v254_v8 = vld [vmem:[#allocation7 + $0x18] sm:$0xff] }
  0x11   :  { %v253_v9 = vld [vmem:[#allocation7 + $0x10] sm:$0xff]  ;;  %v252_v10 = vld [vmem:[#allocation7 + $0x8] sm:$0xff]  ;;  %v251_v11 = vld [vmem:[#allocation7] sm:$0xff] }
  0x12   :  { %v265_v12 = vld [vmem:[%s425_s2] ss:$0 sm:$0xff] }
  0x13   :  { %100 = vmatpush.bf16.msra.mxu0 %v249_v2  ;;  %v266_v18 = vld [vmem:[%s427_s4] ss:$0 sm:$0xff] }
  0x14   :  { %177 = vmatpush.bf16.msra.mxu1 %v257_v4 }
  0x16   :  { %216 = vmatmul.msk.bf16.vlgmr.msra.gmra.mxu0 %vm89_vm0, %v68_v5 }
  0x18   :  { %178 = vmatpush.bf16.msra.mxu1 %v256_v6 }
  0x1c   :  { %179 = vmatpush.bf16.msra.mxu1 %v255_v7 }
  0x20   :  { %180 = vmatpush.bf16.msra.mxu1 %v254_v8 }
  0x24   :  { %181 = vmatpush.bf16.msra.mxu1 %v253_v9 }
  0x28   :  { %182 = vmatpush.bf16.msra.mxu1 %v252_v10 }
  0x2c   :  { %183 = vmatpush.bf16.msra.mxu1 %v251_v11 }
  0x93   :  { %v102_v13 = vpop.f32.mrf.mxu0 }
  0x94   :  { %v103_v14 = vadd.f32 %v265_v12, %v102_v13 }
  0x96   :  { %v106_v15 = vmax.f32 %v103_v14, 0.0 }
  0x98   :  { %v107_v16 = vpack.c.bf16 %v106_v15, %v106_v15 }
  0x9a   :  { %184 = vmatmul.bf16.vlgmr.msra.gmra.mxu1 %v107_v16 }
  0x9b   :  { %v104_v17 = vpop.f32.mrf.mxu0 }
 0x117   :  { %v185_v19 = vpop.f32.mrf.mxu1 }
 0x118   :  { %v186_v20 = vadd.f32 %v266_v18, %v185_v19 }
 0x11a   :  { %189 = vst [vmem:[#allocation8] sm:$0xff] %v186_v20 }
 0x11b   :  { %200 = dma.vmem_to_hbm [thread:$0]  %s196_s12, 128, %s198_s15, [#allocation4]  }
 0x11f   :  { %v187_v21 = vpop.f32.mrf.mxu1 }
 0x120   :  { %367 = dma.done.wait [#allocation4], 128  }
 0x121   :  { %368 = vsyncadd [#allocation4], 4294967168 }
 0x122   :  { %205 = vsyncpa [#allocation3], 1 }
 0x123   :  { %206 = vsyncpa [#allocation6], 1 }
 0x124   :  { %207 = vsyncpa [#allocation4], 1 }

</bundles_post_ra>
